<compile_context>
chip_gen: v5e
topology: v5e:2x2
jax: 0.10.0
libtpu: 0.0.40
codegen_flags: <defaults>
</compile_context>

<pallas_src>
import functools

import jax
import jax.numpy as jnp
from jax.experimental import pallas as pl
from jax.experimental.pallas import tpu as pltpu


def _pick_tile_n(n, max_tile=512, min_steps=4):
    """Batch tile: multiple of 8, divides n evenly when possible, grid >= min_steps.

    Keeps v7x's two TensorCores balanced with >=2 pipelined steps each, and
    avoids any padded / wasted rows for the common evenly-divisible case.
    Falls back to a ragged last block (Pallas masks the OOB writes).
    """
    if n <= 8 * min_steps:
        return n                                   # single full block (block == array dim)
    cap = max(8, min(max_tile, n // min_steps))
    cap -= cap % 8
    if n % 8 == 0:
        for t in range(cap, 7, -8):                # largest multiple-of-8 divisor <= cap
            if n % t == 0:
                return t
    return cap                                     # ragged last block


def highway_kernel(x_ref, w_ref, b_ref, o_ref, *, mxu_dtype):
    """One batch tile: fused proj/gate matmul + highway mix.

    x_ref: (TILE_N, E) streamed   w_ref: (E, 2E) resident   b_ref: (1, 2E) resident
    """
    x = x_ref[...]                                  # native dtype, no blanket upcast
    E = x.shape[-1]

    # Single fused MXU matmul -> (TILE_N, 2E), always f32 accumulation.
    y = jnp.dot(x.astype(mxu_dtype), w_ref[...].astype(mxu_dtype),
                preferred_element_type=jnp.float32)
    y = y + b_ref[...].astype(jnp.float32)          # one bias add on the fused result

    proj = jnp.maximum(y[:, :E], 0.0)               # relu branch (VPU)
    gate = jax.nn.sigmoid(y[:, E:])                 # sigmoid branch (EUP)

    # gate*proj + (1-gate)*x  ==  x + gate*(proj - x)   (one fewer vmul)
    xf = x.astype(jnp.float32)                      # no-op when x is already f32
    o_ref[...] = (xf + gate * (proj - xf)).astype(o_ref.dtype)


def prepare_highway_params(w_proj, b_proj, w_gate, b_gate, *, weight_dtype=None):
    """One-time parameter prep (not per forward call).

    PyTorch Linear weights are (out_features, in_features); transpose and
    concatenate along the output dim so the kernel computes x @ W_cat.
    `weight_dtype=jnp.bfloat16` halves the resident weight footprint and
    feeds the MXU bf16 (use with mxu_dtype=jnp.bfloat16 in highway_forward).
    """
    E = w_proj.shape[0]
    w_cat = jnp.concatenate([w_proj.T, w_gate.T], axis=1)              # (E, 2E)
    if weight_dtype is not None:
        w_cat = w_cat.astype(weight_dtype)
    b_cat = jnp.concatenate([b_proj, b_gate]).astype(jnp.float32).reshape(1, 2 * E)
    return w_cat, b_cat


def highway_forward(x, w_cat, b_cat, *, max_tile=512, mxu_dtype=None):
    """x: (N, E); w_cat: (E, 2E); b_cat: (1, 2E). Returns (N, E) in x.dtype."""
    N, E = x.shape
    tile_n = _pick_tile_n(N, max_tile=max_tile)
    grid = (pl.cdiv(N, tile_n),)                    # ragged last block OK (no padding)

    mxu_dtype = x.dtype if mxu_dtype is None else mxu_dtype

    x_b = jnp.dtype(x.dtype).itemsize
    w_b = jnp.dtype(w_cat.dtype).itemsize

    # Real buffer math with ~2x headroom (keep well under 64 MiB for v7x).
    est = (2 * tile_n * E * x_b                     # x tile, double-buffered
           + 2 * tile_n * E * x_b                   # out tile, double-buffered
           + 2 * E * (2 * E) * w_b                  # resident fused weight (2 bufs)
           + 2 * 8 * (2 * E) * 4)                   # fused bias (padded to 8 sublanes)
    vmem_limit = int(min(max(2 * est, 4 << 20), 48 << 20))

    cost = pl.CostEstimate(
        flops=2 * N * E * (2 * E),
        transcendentals=N * E,                      # sigmoid
        bytes_accessed=2 * N * E * x_b + E * (2 * E) * w_b + (2 * E) * 4,
    )

    kernel = functools.partial(highway_kernel, mxu_dtype=mxu_dtype)

    return pl.pallas_call(
        kernel,
        out_shape=jax.ShapeDtypeStruct((N, E), x.dtype),
        grid=grid,
        in_specs=[
            pl.BlockSpec((tile_n, E), lambda i: (i, 0)),   # x: streamed/pipelined
            # On v7x, pipeline_mode=pl.Buffered(1) on the two resident specs
            # would single-buffer them; bf16 weight storage achieves a similar
            # VMEM saving and is exposed via prepare_highway_params.
            pl.BlockSpec((E, 2 * E), lambda i: (0, 0)),    # fused weight: resident
            pl.BlockSpec((1, 2 * E), lambda i: (0, 0)),    # fused bias: resident
        ],
        out_specs=pl.BlockSpec((tile_n, E), lambda i: (i, 0)),
        compiler_params=pltpu.CompilerParams(
            dimension_semantics=("parallel",),
            vmem_limit_bytes=vmem_limit,
        ),
        cost_estimate=cost,
    )(x, w_cat, b_cat)


def highway_reference(x, w_proj, b_proj, w_gate, b_gate):
    """Pure-JAX reference matching the PyTorch forward exactly."""
    x_proj = jax.nn.relu(x @ w_proj.T + b_proj)
    x_gate = jax.nn.sigmoid(x @ w_gate.T + b_gate)
    return x_gate * x_proj + (1.0 - x_gate) * x


if __name__ == "__main__":
    key = jax.random.PRNGKey(0)
    k_x, k_wp, k_bp, k_wg, k_bg = jax.random.split(key, 5)

    batch = 384        # multiple of 8, tests the even-divisor tile picker (96 x 4)
    emb_size = 128     # lane width

    x = jax.random.normal(k_x, (batch, emb_size), dtype=jnp.float32)

    # PyTorch Linear shapes: weight (out, in), bias (out,)
    bound = 1.0 / jnp.sqrt(emb_size)
    w_proj = jax.random.uniform(k_wp, (emb_size, emb_size), jnp.float32, -bound, bound)
    b_proj = jax.random.uniform(k_bp, (emb_size,), jnp.float32, -bound, bound)
    w_gate = jax.random.uniform(k_wg, (emb_size, emb_size), jnp.float32, -bound, bound)
    b_gate = jax.random.uniform(k_bg, (emb_size,), jnp.float32, -bound, bound)

    ref = highway_reference(x, w_proj, b_proj, w_gate, b_gate)

    # Default (f32) path: matches the PyTorch module to 1e-5.
    w_cat, b_cat = prepare_highway_params(w_proj, b_proj, w_gate, b_gate)
    w_cat, b_cat = jax.block_until_ready((w_cat, b_cat))
    out = jax.block_until_ready(highway_forward(x, w_cat, b_cat))
    assert out.shape == (batch, emb_size)
    assert jnp.allclose(out, ref, atol=1e-5, rtol=1e-5), "f32 mismatch vs reference"

    # Optional bf16-at-MXU path (v5e/v6e/v7x throughput/VMEM win); looser tolerance.
    w_bf, b_bf = prepare_highway_params(w_proj, b_proj, w_gate, b_gate,
                                        weight_dtype=jnp.bfloat16)
    out_bf = jax.block_until_ready(
        highway_forward(x, w_bf, b_bf, mxu_dtype=jnp.bfloat16))
    assert jnp.allclose(out_bf, ref, atol=5e-2, rtol=5e-2), "bf16 mismatch vs reference"

    print("KERNEL_OK")
</pallas_src>

<mosaic_0001>
module attributes {stable_mosaic.version = 11 : i64} {
  func.func @highway_kernel(%arg0: i32, %arg1: memref<96x128xf32, #tpu.memory_space<vmem>>, %arg2: memref<128x256xf32, #tpu.memory_space<vmem>>, %arg3: memref<1x256xf32, #tpu.memory_space<vmem>>, %arg4: memref<96x128xf32, #tpu.memory_space<vmem>>) attributes {dimension_semantics = [#tpu.dimension_semantics<parallel>], iteration_bounds = array<i64: 4>, scalar_prefetch = 0 : i64, scratch_operands = 0 : i64, tpu.core_type = #tpu.core_type<tc>, window_params = [{transform_indices = @transform_0, window_bounds = array<i64: 96, 128>}, {pipeline_mode = #tpu.pipeline_mode<synchronous>, transform_indices = @transform_1, window_bounds = array<i64: 128, 256>}, {pipeline_mode = #tpu.pipeline_mode<synchronous>, transform_indices = @transform_2, window_bounds = array<i64: 1, 256>}, {transform_indices = @transform_3, window_bounds = array<i64: 96, 128>}]} {
    %c0 = arith.constant 0 : index
    %c0_0 = arith.constant 0 : index
    %0 = vector.load %arg1[%c0, %c0_0] : memref<96x128xf32, #tpu.memory_space<vmem>>, vector<96x128xf32>
    %c0_1 = arith.constant 0 : index
    %c0_2 = arith.constant 0 : index
    %1 = vector.load %arg2[%c0_1, %c0_2] : memref<128x256xf32, #tpu.memory_space<vmem>>, vector<128x256xf32>
    %cst = arith.constant dense<0.000000e+00> : vector<96x256xf32>
    %2 = tpu.matmul %0, %1, %cst {dimension_numbers = #tpu.dot_dimension_numbers<[1], [0], [0], [1], [0, 0, 1, 1], [], []>} : vector<96x128xf32>, vector<128x256xf32>, vector<96x256xf32> -> vector<96x256xf32>
    %c0_3 = arith.constant 0 : index
    %c0_4 = arith.constant 0 : index
    %3 = vector.load %arg3[%c0_3, %c0_4] : memref<1x256xf32, #tpu.memory_space<vmem>>, vector<1x256xf32>
    %4 = vector.broadcast %3 : vector<1x256xf32> to vector<96x256xf32>
    %5 = arith.addf %2, %4 : vector<96x256xf32>
    %6 = vector.extract_strided_slice %5 {offsets = [0, 0], sizes = [96, 128], strides = [1, 1]} : vector<96x256xf32> to vector<96x128xf32>
    %cst_5 = arith.constant 0.000000e+00 : f32
    %7 = vector.broadcast %cst_5 : f32 to vector<96x128xf32>
    %8 = arith.maximumf %6, %7 : vector<96x128xf32>
    %9 = vector.extract_strided_slice %5 {offsets = [0, 128], sizes = [96, 128], strides = [1, 1]} : vector<96x256xf32> to vector<96x128xf32>
    %10 = arith.negf %9 : vector<96x128xf32>
    %11 = math.exp %10 : vector<96x128xf32>
    %cst_6 = arith.constant 1.000000e+00 : f32
    %12 = vector.broadcast %cst_6 : f32 to vector<96x128xf32>
    %13 = arith.addf %12, %11 : vector<96x128xf32>
    %14 = arith.divf %12, %13 : vector<96x128xf32>
    %15 = arith.subf %8, %0 : vector<96x128xf32>
    %16 = arith.mulf %14, %15 : vector<96x128xf32>
    %17 = arith.addf %0, %16 : vector<96x128xf32>
    %c0_7 = arith.constant 0 : index
    %c0_8 = arith.constant 0 : index
    %18 = vector.load %arg4[%c0_7, %c0_8] : memref<96x128xf32, #tpu.memory_space<vmem>>, vector<96x128xf32>
    tpu.vector_store %arg4[%c0_7, %c0_8], %17 {strides = array<i32>} : memref<96x128xf32, #tpu.memory_space<vmem>>, vector<96x128xf32>,
    return
  }
  func.func @transform_0(%arg0: i32) -> (i32, i32) {
    %c0_i32 = arith.constant 0 : i32
    %c0_i32_0 = arith.constant 0 : i32
    return %arg0, %c0_i32 : i32, i32
  }
  func.func @transform_1(%arg0: i32) -> (i32, i32) {
    %c0_i32 = arith.constant 0 : i32
    %c0_i32_0 = arith.constant 0 : i32
    %c0_i32_1 = arith.constant 0 : i32
    return %c0_i32, %c0_i32_0 : i32, i32
  }
  func.func @transform_2(%arg0: i32) -> (i32, i32) {
    %c0_i32 = arith.constant 0 : i32
    %c0_i32_0 = arith.constant 0 : i32
    %c0_i32_1 = arith.constant 0 : i32
    return %c0_i32, %c0_i32_0 : i32, i32
  }
  func.func @transform_3(%arg0: i32) -> (i32, i32) {
    %c0_i32 = arith.constant 0 : i32
    %c0_i32_0 = arith.constant 0 : i32
    return %arg0, %c0_i32 : i32, i32
  }
}

</mosaic_0001>

<bundles_post_ra>
// kernel: tpu_custom_call.1
= control target key start
LH: loop header
LB: loop body
LE: loop exit
PB: predicated region body
PF: predicated region fallthrough
CT: control target
= control target key end

     0   :  { %8 = vsyncpa [#allocation3], 0  ;;  %s1657_s0 = inlined_call_operand.hbm [shape: f32[384,128], index: 0, kind: input, shape index: {}]   ;;  %s1658_s1 = inlined_call_operand.hbm [shape: f32[128,256], index: 1, kind: input, shape index: {}]   ;;  %s1659_s2 = inlined_call_operand.hbm [shape: f32[1,256], index: 2, kind: input, shape index: {}]   ;;  %s1660_s3 = inlined_call_operand.hbm [shape: f32[384,128], index: 3, kind: output, shape index: {}]  }
   0x1   :  { %10 = vsyncpa [#allocation3 + $0x1], 0 }
   0x2   :  { %11 = vsyncpa [#allocation6], 0 }
   0x3   :  { %12 = vsyncpa [#allocation4], 0 }
   0x4   :  { %14 = vsyncpa [#allocation4 + $0x1], 0  ;;  %s1147_s12 = smov 0   ;;  %s1149_s13 = smov 0  }
   0x5   :  { %s1151_s14 = smov 0   ;;  %s1153_s15 = smov 0  }
   0x6 LB: > { %s1168_s16 = sadd.s32 4294967295, %s1117_s15   ;;  %s776_s17 = sadd.s32 4294967294, %s1117_s15   ;;  %s1117_s15 = sphi %s1153_s15, %s1693_s15   ;;  %s1113_s14 = sphi %s1151_s14, %s1692_s14   ;;  %s1109_s13 = sphi %s1149_s13, %s1691_s13   ;;  %s1105_s12 = sphi %s1147_s12, %s1690_s12  }
   0x7   : > { %p40_p0 = scmp.ne.s32.totalorder %s1109_s13, %s1105_s12  ;;  %p41_p1 = scmp.eq.s32.totalorder %s1168_s16, 0 }
   0x8   : > { %p106_p2 = scmp.eq.s32.totalorder %s1168_s16, 3  ;;  %p112_p3 = scmp.eq.s32.totalorder %s776_s17, 3 }
   0x9   : > { %p1177_p4 = por %p41_p1, %p40_p0  ;;  %p777_p5 = scmp.ge.s32.totalorder %s1117_s15, 1 }
   0xa   : > { %p1182_p6 = por %p112_p3, %p40_p0  ;;  %p119_p7 = scmp.lt.s32.totalorder %s1117_s15, 5 }
   0xb   : > { %s130_s22 = sshll.u32 %s1658_s1, 4  ;;  %s1119_s24 = smov [#allocation5]   ;;  %s131_s22 = int_to_ptr.hbm [resolvable:$true] %s130_s22 }
   0xc   : > { %p1190_p8 = pnand %p777_p5, %p119_p7  ;;  %s132_s25 = sshll.u32 %s1119_s24, 4  ;;  %s133_s25 = int_to_ptr.vmem [resolvable:$true] %s132_s25 }
   0xd   : > { %s145_s28 = sshll.u32 %s1659_s2, 4  ;;  %s1120_s29 = smov 256   ;;  %s146_s28 = int_to_ptr.hbm [resolvable:$true] %s145_s28 }
   0xe   : > { %p848_p9 = pneg %p1190_p8  ;;  %s1121_s30 = smov 16  }
   0xf   : > { %s1122_s4 = smov [#allocation7]   ;;  %s1202_s6 = sadd.s32 1, %s1117_s15  }
  0x10   : > { %p849_p10 = pnand %p848_p9, %p41_p1  ;;  %s147_s5 = sshll.u32 %s1122_s4, 4  ;;  %s148_s5 = int_to_ptr.vmem [resolvable:$true] %s147_s5 }
  0x11   : > { %s27_s7 = sadd.s32 1, %s1113_s14  ;;  %s24_s8 = ssub.s32 %s1117_s15, %s1202_s6 }
  0x12   : > { %851 = dma.hbm_to_vmem [thread:$0]  (!%p849_p10), %s131_s22, 4096, %s133_s25, [#allocation6], %s1120_s29, %s1120_s29, %s1121_s30  }
  0x13   : > { %854 = dma.hbm_to_vmem [thread:$0]  (!%p849_p10), %s146_s28, 32, %s148_s5, [#allocation6]  }
  0x14   : > { %p34_p11 = scmp.ne.s32.totalorder %s1113_s14, %s1109_s13  ;;  %p25_p12 = scmp.eq.s32.totalorder %s24_s8, 0 }
  0x15   : > { %p35_p13 = scmp.eq.s32.totalorder %s1117_s15, 0  ;;  %p865_p3 = scmp.lt.s32.totalorder %s1117_s15, 4 }
  0x16   : > { %p1212_p0 = por %p106_p2, %p34_p11  ;;  %s158_s11 = sand.u32 1, %s1113_s14  }
  0x17   : > { %s1218_s10 = scalar_select %p25_p12, %s1113_s14, %s27_s7  }
  0x18   : > { %p36_p5 = por %p35_p13, %p34_p11  ;;  %s834_s17 = smul.u32 96, %s158_s11 }
  0x19   : > { %s800_s20 = smul.u32 96, %s1117_s15  ;;  %s159_s29 = scalar_lea.sflag [#allocation3], %s158_s11 }
  0x1a   : > { %p1222_p7 = pnand %p865_p3, %p36_p5  ;;  %s162_s26 = scalar_lea.vmem [#allocation2], %s834_s17 }
  0x1b   : > { %s167_s25 = scalar_lea.hbm %s1657_s0, %s800_s20  ;;  %s170_s27 = sshll.u32 %s162_s26, 4  ;;  %s171_s27 = int_to_ptr.vmem [resolvable:$true] %s170_s27 }
  0x1c   : > { %s168_s28 = sshll.u32 %s167_s25, 4  ;;  %p1021_p9 = pneg %p1222_p7  ;;  %s169_s28 = int_to_ptr.hbm [resolvable:$true] %s168_s28 }
  0x1d   : > { %s1017_s30 = sshra.s32 %s169_s28, 4  ;;  %s1024_s8 = scalar_lea.hbm %s1657_s0, 384  ;;  %s1018_s30 = int_to_ptr.hbm [resolvable:$true] %s1017_s30 }
  0x1e   : > { %s1019_s4 = scalar_lea.hbm %s1018_s30, 96  ;;  %p1025_p12 = scmp.lt.s32.totalorder %s1018_s30, %s1657_s0 }
  0x1f   : > { %p1020_p2 = scmp.ne.s32.totalorder %s1018_s30, %s1019_s4  ;;  %p1026_p13 = scmp.lt.s32.totalorder %s1024_s8, %s1019_s4 }
  0x21   : > { %p1022_p10 = pnand %p1021_p9, %p1020_p2  ;;  %p1027_p3 = por %p1026_p13, %p1025_p12 }
  0x23   : > { %p1023_p11 = pneg %p1022_p10 }
  0x25   : > { %p1028_p5 = pnand %p1027_p3, %p1023_p11 }
  0x27   : > { %1031 = shalt.err (!%p1028_p5)
}
  0x28   : > { %s1123_s11 = smov 128   ;;  %s1124_s17 = smov 8  }
  0x29   : > { %858 = dma.hbm_to_vmem [thread:$0]  (!%p1222_p7), %s169_s28, 1536, %s171_s27, %s159_s29, %s1123_s11, %s1123_s11, %s1124_s17  }
  0x2a   : > { %182 = sbr.rel (%p1190_p8) target bundleno = 295 (0x127), region = 32  ;;  %s1242_s24 = sand.u32 (!%p1190_p8), 1, %s1109_s13  }
  0x2b   : > { %s835_s25 = smul.u32 (!%p1190_p8), 96, %s1242_s24  ;;  %s185_s26 = scalar_lea.sflag (!%p1190_p8), [#allocation3], %s1242_s24 }
  0x2d   : > { %s1248_s30 = scalar_lea.vmem (!%p1190_p8), [#allocation2], %s835_s25 }
  0x2f   : > { %1092 = dma.done.wait (%p1177_p4), %s185_s26, 1536  }
  0x30   : > { %1094 = vsyncadd (%p1177_p4), %s185_s26, 4294965760 }
  0x31   : > { %1096 = dma.done.wait (%p41_p1), [#allocation6], 4128  }
  0x32   : > { %1098 = vsyncadd (%p41_p1), [#allocation6], 4294963168  ;;  %v267_v0 = vld [vmem:[#allocation5 + $0xf8] sm:$0xff]  ;;  %v265_v1 = vld [vmem:[#allocation5 + $0xe8] sm:$0xff]  ;;  %s1414_s18 = scalar_lea.vmem [#allocation8], %s835_s25  ;;  %s801_s23 = smul.u32 96, %s1168_s16 }
  0x33   : > { %327 = vmatpush.msra.mxu1 %v267_v0  ;;  %818 = vmatpush.msra.mxu3 %v267_v0  ;;  %v263_v2 = vld [vmem:[#allocation5 + $0xd8] sm:$0xff]  ;;  %v261_v3 = vld [vmem:[#allocation5 + $0xc8] sm:$0xff]  ;;  %v266_v4 = vld [vmem:[#allocation5 + $0xf0] sm:$0xff]  ;;  %s681_s28 = sshll.u32 %s1414_s18, 4  ;;  %s669_s4 = scalar_lea.sflag [#allocation4], %s1242_s24  ;;  %s682_s28 = int_to_ptr.vmem [resolvable:$true] %s681_s28 }
  0x34   : > { %v264_v5 = vld [vmem:[#allocation5 + $0xe0] sm:$0xff]  ;;  %v259_v6 = vld [vmem:[#allocation5 + $0xb8] sm:$0xff]  ;;  %274 = vmatpush.msra.mxu0 %v266_v4  ;;  %802 = vmatpush.msra.mxu2 %v266_v4  ;;  %v262_v7 = vld [vmem:[#allocation5 + $0xd0] sm:$0xff]  ;;  %s680_s27 = scalar_lea.hbm %s1660_s3, %s801_s23  ;;  %s1067_s20 = scalar_lea.hbm %s1660_s3, 384 }
  0x35   : > { %328 = vmatpush.msra.mxu1 %v265_v1  ;;  %819 = vmatpush.msra.mxu3 %v265_v1  ;;  %v257_v8 = vld [vmem:[#allocation5 + $0xa8] sm:$0xff]  ;;  %v260_v9 = vld [vmem:[#allocation5 + $0xc0] sm:$0xff]  ;;  %v255_v10 = vld [vmem:[#allocation5 + $0x98] sm:$0xff]  ;;  %s683_s29 = sshll.u32 %s680_s27, 4  ;;  %s684_s29 = int_to_ptr.hbm [resolvable:$true] %s683_s29 }
  0x36   : > { %275 = vmatpush.msra.mxu0 %v264_v5  ;;  %803 = vmatpush.msra.mxu2 %v264_v5  ;;  %v258_v11 = vld [vmem:[#allocation5 + $0xb0] sm:$0xff]  ;;  %v253_v12 = vld [vmem:[#allocation5 + $0x88] sm:$0xff]  ;;  %v256_v13 = vld [vmem:[#allocation5 + $0xa0] sm:$0xff]  ;;  %s1061_s5 = sshra.s32 %s684_s29, 4  ;;  %s1062_s5 = int_to_ptr.hbm [resolvable:$true] %s1061_s5 }
  0x37   : > { %329 = vmatpush.msra.mxu1 %v263_v2  ;;  %820 = vmatpush.msra.mxu3 %v263_v2  ;;  %v251_v14 = vld [vmem:[#allocation5 + $0x78] sm:$0xff]  ;;  %v254_v15 = vld [vmem:[#allocation5 + $0x90] sm:$0xff]  ;;  %v249_v16 = vld [vmem:[#allocation5 + $0x68] sm:$0xff]  ;;  %s1063_s7 = scalar_lea.hbm %s1062_s5, 96  ;;  %p1068_p7 = scmp.lt.s32.totalorder %s1062_s5, %s1660_s3 }
  0x38   : > { %276 = vmatpush.msra.mxu0 %v262_v7  ;;  %804 = vmatpush.msra.mxu2 %v262_v7  ;;  %v252_v17 = vld [vmem:[#allocation5 + $0x80] sm:$0xff]  ;;  %v247_v18 = vld [vmem:[#allocation5 + $0x58] sm:$0xff]  ;;  %v250_v19 = vld [vmem:[#allocation5 + $0x70] sm:$0xff]  ;;  %p1064_p1 = scmp.ne.s32.totalorder %s1062_s5, %s1063_s7  ;;  %p1069_p2 = scmp.lt.s32.totalorder %s1067_s20, %s1063_s7 }
  0x39   : > { %330 = vmatpush.msra.mxu1 %v261_v3  ;;  %821 = vmatpush.msra.mxu3 %v261_v3  ;;  %v245_v20 = vld [vmem:[#allocation5 + $0x48] sm:$0xff]  ;;  %v248_v21 = vld [vmem:[#allocation5 + $0x60] sm:$0xff]  ;;  %v243_v22 = vld [vmem:[#allocation5 + $0x38] sm:$0xff] }
  0x3a   : > { %277 = vmatpush.msra.mxu0 %v260_v9  ;;  %805 = vmatpush.msra.mxu2 %v260_v9  ;;  %v246_v23 = vld [vmem:[#allocation5 + $0x50] sm:$0xff]  ;;  %v241_v24 = vld [vmem:[#allocation5 + $0x28] sm:$0xff]  ;;  %v244_v25 = vld [vmem:[#allocation5 + $0x40] sm:$0xff]  ;;  %p1065_p4 = pnand %p1064_p1, %p1212_p0  ;;  %p1070_p9 = por %p1069_p2, %p1068_p7 }
  0x3b   : > { %331 = vmatpush.msra.mxu1 %v259_v6  ;;  %822 = vmatpush.msra.mxu3 %v259_v6  ;;  %v239_v26 = vld [vmem:[#allocation5 + $0x18] sm:$0xff]  ;;  %v242_v27 = vld [vmem:[#allocation5 + $0x30] sm:$0xff]  ;;  %v237_v28 = vld [vmem:[#allocation5 + $0x8] sm:$0xff] }
  0x3c   : > { %278 = vmatpush.msra.mxu0 %v258_v11  ;;  %806 = vmatpush.msra.mxu2 %v258_v11  ;;  %v1259_v29 = vld [vmem:[%s1248_s30] sm:$0xff]  ;;  %v1262_v30 = vld [vmem:[%s1248_s30 + $0x30] sm:$0xff]  ;;  %v1267_v34 = vld [vmem:[%s1248_s30 + $0x8] sm:$0xff]  ;;  %p1066_p8 = pneg %p1065_p4 }
  0x3d   : > { %332 = vmatpush.msra.mxu1 %v257_v8  ;;  %823 = vmatpush.msra.mxu3 %v257_v8  ;;  %v240_v31 = vld [vmem:[#allocation5 + $0x20] sm:$0xff]  ;;  %v238_v32 = vld [vmem:[#allocation5 + $0x10] sm:$0xff]  ;;  %v1270_v35 = vld [vmem:[%s1248_s30 + $0x38] sm:$0xff] }
  0x3e   : > { %279 = vmatpush.msra.mxu0 %v256_v13  ;;  %807 = vmatpush.msra.mxu2 %v256_v13  ;;  %v236_v33 = vld [vmem:[#allocation5] sm:$0xff]  ;;  %v1277_v36 = vld [vmem:[%s1248_s30 + $0x10] sm:$0xff]  ;;  %v1287_v38 = vld [vmem:[%s1248_s30 + $0x18] sm:$0xff]  ;;  %p1071_p10 = pnand %p1070_p9, %p1066_p8 }
  0x3f   : > { %333 = vmatpush.msra.mxu1 %v255_v10  ;;  %824 = vmatpush.msra.mxu3 %v255_v10  ;;  %v1280_v37 = vld [vmem:[%s1248_s30 + $0x40] sm:$0xff]  ;;  %v1290_v39 = vld [vmem:[%s1248_s30 + $0x48] sm:$0xff]  ;;  %v1300_v41 = vld [vmem:[%s1248_s30 + $0x50] sm:$0xff] }
  0x40   : > { %280 = vmatpush.msra.mxu0 %v254_v15  ;;  %808 = vmatpush.msra.mxu2 %v254_v15  ;;  %v1297_v40 = vld [vmem:[%s1248_s30 + $0x20] sm:$0xff]  ;;  %v1307_v42 = vld [vmem:[%s1248_s30 + $0x28] sm:$0xff]  ;;  %v1310_v43 = vld [vmem:[%s1248_s30 + $0x58] sm:$0xff] }
  0x41   : > { %334 = vmatpush.msra.mxu1 %v253_v12  ;;  %825 = vmatpush.msra.mxu3 %v253_v12  ;;  %v268_v44 = vld [vmem:[#allocation7] sm:$0x3] }
  0x42   : > { %281 = vmatpush.msra.mxu0 %v252_v17  ;;  %809 = vmatpush.msra.mxu2 %v252_v17  ;;  %v1318_v45 = vperm.slane %v268_v44, 1  ;;  %v1323_v55 = vperm.slane %v268_v44, 0 }
  0x43   : > { %335 = vmatpush.msra.mxu1 %v251_v14  ;;  %826 = vmatpush.msra.mxu3 %v251_v14 }
  0x44   : > { %282 = vmatpush.msra.mxu0 %v250_v19  ;;  %810 = vmatpush.msra.mxu2 %v250_v19 }
  0x45   : > { %336 = vmatpush.msra.mxu1 %v249_v16  ;;  %827 = vmatpush.msra.mxu3 %v249_v16 }
  0x46   : > { %283 = vmatpush.msra.mxu0 %v248_v21  ;;  %811 = vmatpush.msra.mxu2 %v248_v21 }
  0x47   : > { %337 = vmatpush.msra.mxu1 %v247_v18  ;;  %828 = vmatpush.msra.mxu3 %v247_v18 }
  0x48   : > { %284 = vmatpush.msra.mxu0 %v246_v23  ;;  %812 = vmatpush.msra.mxu2 %v246_v23 }
  0x49   : > { %338 = vmatpush.msra.mxu1 %v245_v20  ;;  %829 = vmatpush.msra.mxu3 %v245_v20 }
  0x4a   : > { %285 = vmatpush.msra.mxu0 %v244_v25  ;;  %813 = vmatpush.msra.mxu2 %v244_v25 }
  0x4b   : > { %339 = vmatpush.msra.mxu1 %v243_v22  ;;  %830 = vmatpush.msra.mxu3 %v243_v22 }
  0x4c   : > { %286 = vmatpush.msra.mxu0 %v242_v27  ;;  %814 = vmatpush.msra.mxu2 %v242_v27 }
  0x4d   : > { %340 = vmatpush.msra.mxu1 %v241_v24  ;;  %831 = vmatpush.msra.mxu3 %v241_v24 }
  0x4e   : > { %287 = vmatpush.msra.mxu0 %v240_v31  ;;  %815 = vmatpush.msra.mxu2 %v240_v31 }
  0x4f   : > { %341 = vmatpush.msra.mxu1 %v239_v26  ;;  %832 = vmatpush.msra.mxu3 %v239_v26 }
  0x50   : > { %288 = vmatpush.msra.mxu0 %v238_v32  ;;  %816 = vmatpush.msra.mxu2 %v238_v32 }
  0x51   : > { %342 = vmatpush.msra.mxu1 %v237_v28  ;;  %833 = vmatpush.msra.mxu3 %v237_v28 }
  0x52   : > { %343 = vmatmul.f32.vlgmr.msra.gmra.mxu1 %v1259_v29  ;;  %361 = vmatmul.f32.vlgmr.msra.gmra.mxu3 %v1262_v30 }
  0x53   : > { %289 = vmatpush.msra.mxu0 %v236_v33  ;;  %817 = vmatpush.msra.mxu2 %v236_v33 }
  0x54   : > { %290 = vmatmul.f32.vlgmr.msra.gmra.mxu0 %v1259_v29  ;;  %308 = vmatmul.f32.vlgmr.msra.gmra.mxu2 %v1262_v30 }
  0x5a   : > { %346 = vmatmul.f32.gmra.mxu1 %v1267_v34  ;;  %364 = vmatmul.f32.gmra.mxu3 %v1270_v35 }
  0x5c   : > { %293 = vmatmul.f32.gmra.mxu0 %v1267_v34  ;;  %311 = vmatmul.f32.gmra.mxu2 %v1270_v35 }
  0x62   : > { %349 = vmatmul.f32.gmra.mxu1 %v1277_v36  ;;  %367 = vmatmul.f32.gmra.mxu3 %v1280_v37 }
  0x64   : > { %296 = vmatmul.f32.gmra.mxu0 %v1277_v36  ;;  %314 = vmatmul.f32.gmra.mxu2 %v1280_v37 }
  0x6a   : > { %352 = vmatmul.f32.gmra.mxu1 %v1287_v38  ;;  %370 = vmatmul.f32.gmra.mxu3 %v1290_v39 }
  0x6c   : > { %299 = vmatmul.f32.gmra.mxu0 %v1287_v38  ;;  %317 = vmatmul.f32.gmra.mxu2 %v1290_v39 }
  0x72   : > { %355 = vmatmul.f32.gmra.mxu1 %v1297_v40  ;;  %373 = vmatmul.f32.gmra.mxu3 %v1300_v41 }
  0x74   : > { %302 = vmatmul.f32.gmra.mxu0 %v1297_v40  ;;  %320 = vmatmul.f32.gmra.mxu2 %v1300_v41 }
  0x7a   : > { %358 = vmatmul.f32.gmra.mxu1 %v1307_v42  ;;  %376 = vmatmul.f32.gmra.mxu3 %v1310_v43 }
  0x7c   : > { %305 = vmatmul.f32.gmra.mxu0 %v1307_v42  ;;  %323 = vmatmul.f32.gmra.mxu2 %v1310_v43 }
  0xcf   : > { %v344_v46 = vpop.f32.mrf.mxu1 }
  0xd0   : > { %v345_v47 = vadd.f32 %v344_v46, %v1318_v45 }
  0xd1   : > { %v291_v50 = vpop.f32.mrf.mxu0 }
  0xd2   : > { %v785_v48 = vmul.f32 -1.442695, %v345_v47  ;;  %v292_v60 = vadd.f32 %v291_v50, %v1323_v55 }
  0xd4   : > { %909 = vpow2.f32 %v785_v48  ;;  %v380_v6 = vmax.f32 %v292_v60, 0.0 }
  0xd5   : > { %v362_v49 = vpop.f32.mrf.mxu3 }
  0xd6   : > { %v363_v51 = vadd.f32 %v362_v49, %v1318_v45  ;;  %v620_v17 = vsub.f32 %v380_v6, %v1259_v29 }
  0xd7   : > { %v347_v52 = vpop.f32.mrf.mxu1  ;;  %v309_v59 = vpop.f32.mrf.mxu2 }
  0xd8   : > { %v791_v53 = vmul.f32 -1.442695, %v363_v51  ;;  %v348_v54 = vadd.f32 %v347_v52, %v1318_v45  ;;  %v310_v0 = vadd.f32 %v309_v59, %v1323_v55 }
  0xd9   : > { %v294_v62 = vpop.f32.mrf.mxu0 }
  0xda   : > { %v910_v56 = vpop.eup %909  ;;  %911 = vpow2.f32 %v791_v53  ;;  %v786_v57 = vmul.f32 -1.442695, %v348_v54  ;;  %v295_v2 = vadd.f32 %v294_v62, %v1323_v55  ;;  %v386_v12 = vmax.f32 %v310_v0, 0.0 }
  0xdb   : > { %v1325_v58 = vadd.f32 1.0, %v910_v56 }
  0xdc   : > { %913 = vpow2.f32 %v786_v57  ;;  %v381_v15 = vmax.f32 %v295_v2, 0.0  ;;  %v1352_v26 = vsub.f32 %v386_v12, %v1262_v30 }
  0xdd   : > { %915 = vrcp.f32 %v1325_v58  ;;  %v365_v61 = vpop.f32.mrf.mxu3  ;;  %v449_v8 = vand.u32 2147483647, %v1325_v58  ;;  %v451_v9 = vand.u32 2147483648, %v1325_v58  ;;  %vm445_vm0 = vweird.f32 %v1325_v58 }
  0xde   : > { %v366_v63 = vadd.f32 %v365_v61, %v1318_v45  ;;  %v1356_v32 = vsub.f32 %v381_v15, %v1267_v34 }
  0xdf   : > { %v350_v1 = vpop.f32.mrf.mxu1  ;;  %v312_v18 = vpop.f32.mrf.mxu2  ;;  %vm1344_vm1 = vcmp.eq.f32.partialorder %v449_v8, 8.507059e+37  ;;  %v452_v21 = vor.u32 1.1754944e-38, %v451_v9 }
  0xe0   : > { %v912_v3 = vpop.eup %911  ;;  %v792_v4 = vmul.f32 -1.442695, %v366_v63  ;;  %v351_v5 = vadd.f32 %v350_v1, %v1318_v45  ;;  %v313_v33 = vadd.f32 %v312_v18, %v1323_v55 }
  0xe1   : > { %v1333_v7 = vadd.f32 1.0, %v912_v3  ;;  %v297_v27 = vpop.f32.mrf.mxu0 }
  0xe2   : > { %v914_v10 = vpop.eup %913  ;;  %917 = vpow2.f32 %v792_v4  ;;  %v787_v11 = vmul.f32 -1.442695, %v351_v5  ;;  %v1366_v53 = vadd.f32 %v297_v27, %v1323_v55  ;;  %v387_v0 = vmax.f32 %v313_v33, 0.0 }
  0xe3   : > { %v916_v13 = vpop.eup %915  ;;  %919 = vrcp.f32 %v1333_v7  ;;  %v1338_v14 = vadd.f32 1.0, %v914_v10  ;;  %v541_v22 = vand.u32 2147483648, %v1333_v7  ;;  %v539_v25 = vand.u32 2147483647, %v1333_v7 }
  0xe4   : > { %v441_v16 = vmul.f32 %v916_v13, %v1325_v58  ;;  %921 = vpow2.f32 %v787_v11  ;;  %vm446_vm2 = vweird.f32 %v916_v13  ;;  %vm535_vm3 = vweird.f32 %v1333_v7 }
  0xe5   : > { %923 = vrcp.f32 %v1338_v14  ;;  %v368_v19 = vpop.f32.mrf.mxu3  ;;  %v466_v31 = vand.u32 2147483648, %v1338_v14  ;;  %v464_v49 = vand.u32 2147483647, %v1338_v14  ;;  %v542_v52 = vor.u32 1.1754944e-38, %v541_v22  ;;  %vm447_vm6 = vmor %vm445_vm0, %vm446_vm2 }
  0xe6   : > { %v442_v23 = vsub.f32 1.0, %v441_v16  ;;  %v369_v24 = vadd.f32 %v368_v19, %v1318_v45  ;;  %vm460_vm4 = vweird.f32 %v1338_v14  ;;  %vm1369_vm5 = vcmp.eq.f32.partialorder %v539_v25, 8.507059e+37 }
  0xe7   : > { %v353_v28 = vpop.f32.mrf.mxu1  ;;  %v467_v63 = vor.u32 1.1754944e-38, %v466_v31  ;;  %vm1380_vm7 = vcmp.eq.f32.partialorder %v464_v49, 8.507059e+37  ;;  %v382_v58 = vmax.f32 %v1366_v53, 0.0  ;;  %v1392_v16 = vsub.f32 %v387_v0, %v1270_v35 }
  0xe8   : > { %v918_v44 = vpop.eup %917  ;;  %v793_v46 = vmul.f32 -1.442695, %v369_v24  ;;  %v443_v47 = vmul.f32 %v916_v13, %v442_v23  ;;  %v354_v48 = vadd.f32 %v353_v28, %v1318_v45 }
  0xe9   : > { %v920_v50 = vpop.eup %919  ;;  %v1362_v51 = vadd.f32 1.0, %v918_v44  ;;  %v622_v4 = vsub.f32 %v382_v58, %v1277_v36 }
  0xea   : > { %v922_v54 = vpop.eup %921  ;;  %v531_v56 = vmul.f32 %v920_v50, %v1333_v7  ;;  %925 = vpow2.f32 %v793_v46  ;;  %v444_v57 = vadd.f32 %v916_v13, %v443_v47  ;;  %v788_v59 = vmul.f32 -1.442695, %v354_v48 }
  0xeb   : > { %v924_v61 = vpop.eup %923  ;;  %927 = vrcp.f32 %v1362_v51  ;;  %v1374_v62 = vadd.f32 1.0, %v922_v54  ;;  %vm536_vm8 = vweird.f32 %v920_v50  ;;  %v556_v15 = vand.u32 2147483648, %v1362_v51 }
  0xec   : > { %v532_v1 = vsub.f32 1.0, %v531_v56  ;;  %v456_v2 = vmul.f32 %v924_v61, %v1338_v14  ;;  %v448_v3 = vsel %vm447_vm6, %v916_v13, %v444_v57  ;;  %929 = vpow2.f32 %v788_v59  ;;  %vm1402_vm10 = vmor %vm535_vm3, %vm536_vm8 }
  0xed   : > { %931 = vrcp.f32 %v1374_v62  ;;  %v453_v5 = vsel %vm1344_vm1, %v452_v21, %v448_v3  ;;  %v371_v6 = vpop.f32.mrf.mxu3  ;;  %vm461_vm9 = vweird.f32 %v924_v61  ;;  %v554_v13 = vand.u32 2147483647, %v1362_v51 }
  0xee   : > { %v457_v8 = vsub.f32 1.0, %v456_v2  ;;  %v632_v9 = vmul.f32 %v620_v17, %v453_v5  ;;  %v533_v10 = vmul.f32 %v920_v50, %v532_v1  ;;  %v372_v11 = vadd.f32 %v371_v6, %v1318_v45  ;;  %vm462_vm13 = vmor %vm460_vm4, %vm461_vm9  ;;  %v315_v2 = vpop.f32.mrf.mxu2 }
  0xef   : > { %v356_v12 = vpop.f32.mrf.mxu1  ;;  %vm550_vm11 = vweird.f32 %v1362_v51  ;;  %v557_v27 = vor.u32 1.1754944e-38, %v556_v15  ;;  %vm475_vm12 = vweird.f32 %v1374_v62  ;;  %vm1429_vm14 = vcmp.eq.f32.partialorder %v554_v13, 8.507059e+37 }
  0xf0   : > { %v926_v18 = vpop.eup %925  ;;  %v644_v19 = vadd.f32 %v632_v9, %v1259_v29  ;;  %v534_v20 = vadd.f32 %v920_v50, %v533_v10  ;;  %v794_v21 = vmul.f32 -1.442695, %v372_v11  ;;  %v458_v22 = vmul.f32 %v924_v61, %v457_v8 }
  0xf1   : > { %v1395_v17 = vpop.eup %927  ;;  %v1397_v23 = vadd.f32 1.0, %v926_v18  ;;  %v357_v25 = vadd.f32 %v356_v12, %v1318_v45  ;;  %v479_v29 = vand.u32 2147483647, %v1374_v62  ;;  %v316_v13 = vadd.f32 %v315_v2, %v1323_v55 }
  0xf2   : > { %v930_v28 = vpop.eup %929  ;;  %v546_v31 = vmul.f32 %v1395_v17, %v1362_v51  ;;  %656 = vst [vmem:[%s1414_s18] sm:$0xff] %v644_v19  ;;  %v538_v7 = vsel %vm1402_vm10, %v920_v50, %v534_v20  ;;  %933 = vpow2.f32 %v794_v21  ;;  %v459_v33 = vadd.f32 %v924_v61, %v458_v22  ;;  %v300_v22 = vpop.f32.mrf.mxu0 }
  0xf3   : > { %v1419_v44 = vpop.eup %931  ;;  %935 = vrcp.f32 %v1397_v23  ;;  %v1422_v46 = vadd.f32 1.0, %v930_v28  ;;  %v543_v47 = vsel %vm1369_vm5, %v542_v52, %v538_v7  ;;  %v789_v48 = vmul.f32 -1.442695, %v357_v25 }
  0xf4   : > { %v547_v50 = vsub.f32 1.0, %v546_v31  ;;  %v471_v53 = vmul.f32 %v1419_v44, %v1374_v62  ;;  %v638_v54 = vmul.f32 %v1352_v26, %v543_v47  ;;  %v463_v56 = vsel %vm462_vm13, %v924_v61, %v459_v33 }
  0xf5   : > { %937 = vrcp.f32 %v1422_v46  ;;  %v468_v52 = vsel %vm1380_vm7, %v467_v63, %v463_v56  ;;  %vm551_vm15 = vweird.f32 %v1395_v17  ;;  %v374_v14 = vpop.f32.mrf.mxu3  ;;  %vm476_vm0 = vweird.f32 %v1419_v44 }
  0xf6   : > { %v472_v57 = vsub.f32 1.0, %v471_v53  ;;  %v650_v59 = vadd.f32 %v638_v54, %v1262_v30  ;;  %v633_v60 = vmul.f32 %v1356_v32, %v468_v52  ;;  %939 = vpow2.f32 %v789_v48  ;;  %vm552_vm2 = vmor %vm550_vm11, %vm551_vm15  ;;  %v318_v52 = vpop.f32.mrf.mxu2 }
  0xf7   : > { %v548_v26 = vmul.f32 %v1395_v17, %v547_v50  ;;  %v375_v61 = vadd.f32 %v374_v14, %v1318_v45  ;;  %vm1445_vm1 = vcmp.eq.f32.partialorder %v479_v29, 8.507059e+37  ;;  %v481_v63 = vand.u32 2147483648, %v1374_v62  ;;  %v359_v1 = vpop.f32.mrf.mxu1  ;;  %vm477_vm5 = vmor %vm475_vm12, %vm476_vm0 }
  0xf8   : > { %v934_v3 = vpop.eup %933  ;;  %662 = vst [vmem:[%s1414_s18 + $0x30] sm:$0xff] %v650_v59  ;;  %v645_v30 = vadd.f32 %v633_v60, %v1267_v34  ;;  %v473_v32 = vmul.f32 %v1419_v44, %v472_v57  ;;  %v360_v5 = vadd.f32 %v359_v1, %v1318_v45  ;;  %vm565_vm3 = vweird.f32 %v1397_v23 }
  0xf9   : > { %v1455_v6 = vpop.eup %935  ;;  %v1457_v8 = vadd.f32 1.0, %v934_v3  ;;  %v549_v9 = vadd.f32 %v1395_v17, %v548_v26  ;;  %v795_v10 = vmul.f32 -1.442695, %v375_v61  ;;  %v482_v11 = vor.u32 1.1754944e-38, %v481_v63 }
  0xfa   : > { %v561_v12 = vmul.f32 %v1455_v6, %v1397_v23  ;;  %657 = vst [vmem:[%s1414_s18 + $0x8] sm:$0xff] %v645_v30  ;;  %v474_v34 = vadd.f32 %v1419_v44, %v473_v32  ;;  %v790_v58 = vmul.f32 -1.442695, %v360_v5  ;;  %vm566_vm4 = vweird.f32 %v1455_v6 }
  0xfb   : > { %v1469_v15 = vpop.eup %937  ;;  %941 = vrcp.f32 %v1457_v8  ;;  %v553_v18 = vsel %vm552_vm2, %v1395_v17, %v549_v9  ;;  %v388_v31 = vmax.f32 %v316_v13, 0.0  ;;  %v569_v47 = vand.u32 2147483647, %v1397_v23  ;;  %vm1505_vm6 = vmor %vm565_vm3, %vm566_vm4 }
  0xfc   : > { %v940_v19 = vpop.eup %939  ;;  %v562_v20 = vsub.f32 1.0, %v561_v12  ;;  %v486_v51 = vmul.f32 %v1469_v15, %v1422_v46  ;;  %v558_v21 = vsel %vm1429_vm14, %v557_v27, %v553_v18  ;;  %943 = vpow2.f32 %v795_v10  ;;  %v303_v10 = vpop.f32.mrf.mxu0 }
  0xfd   : > { %v1483_v17 = vadd.f32 1.0, %v940_v19  ;;  %v639_v24 = vmul.f32 %v1392_v16, %v558_v21  ;;  %v478_v25 = vsel %vm477_vm5, %v1419_v44, %v474_v34  ;;  %945 = vpow2.f32 %v790_v58  ;;  %v377_v29 = vpop.f32.mrf.mxu3 }
  0xfe   : > { %v487_v28 = vsub.f32 1.0, %v486_v51  ;;  %v483_v27 = vsel %vm1445_vm1, %v482_v11, %v478_v25  ;;  %v563_v7 = vmul.f32 %v1455_v6, %v562_v20  ;;  %v571_v44 = vand.u32 2147483648, %v1397_v23 }
  0xff   : > { %947 = vrcp.f32 %v1483_v17  ;;  %v651_v62 = vadd.f32 %v639_v24, %v1270_v35  ;;  %v634_v33 = vmul.f32 %v622_v4, %v483_v27  ;;  %v628_v48 = vsub.f32 %v388_v31, %v1280_v37  ;;  %v321_v27 = vpop.f32.mrf.mxu2 }
 0x100   : > { %v564_v16 = vadd.f32 %v1455_v6, %v563_v7  ;;  %v378_v49 = vadd.f32 %v377_v29, %v1318_v45  ;;  %vm1509_vm7 = vcmp.eq.f32.partialorder %v569_v47, 8.507059e+37  ;;  %v301_v45 = vadd.f32 %v300_v22, %v1323_v55 }
 0x101   : > { %v1497_v50 = vpop.eup %941  ;;  %663 = vst [vmem:[%s1414_s18 + $0x38] sm:$0xff] %v651_v62  ;;  %v646_v53 = vadd.f32 %v634_v33, %v1277_v36  ;;  %v488_v56 = vmul.f32 %v1469_v15, %v487_v28  ;;  %v572_v57 = vor.u32 1.1754944e-38, %v571_v44  ;;  %vm490_vm8 = vweird.f32 %v1422_v46 }
 0x102   : > { %v944_v14 = vpop.eup %943  ;;  %v576_v36 = vmul.f32 %v1497_v50, %v1457_v8  ;;  %v568_v23 = vsel %vm1505_vm6, %v1455_v6, %v564_v16  ;;  %v796_v59 = vmul.f32 -1.442695, %v378_v49  ;;  %v383_v61 = vmax.f32 %v301_v45, 0.0 }
 0x103   : > { %v946_v60 = vpop.eup %945  ;;  %v1520_v26 = vadd.f32 1.0, %v944_v14  ;;  %658 = vst [vmem:[%s1414_s18 + $0x10] sm:$0xff] %v646_v53  ;;  %v489_v0 = vadd.f32 %v1469_v15, %v488_v56  ;;  %v573_v2 = vsel %vm1509_vm7, %v572_v57, %v568_v23  ;;  %vm491_vm9 = vweird.f32 %v1469_v15 }
 0x104   : > { %v577_v63 = vsub.f32 1.0, %v576_v36  ;;  %v1525_v1 = vadd.f32 1.0, %v946_v60  ;;  %949 = vpow2.f32 %v796_v59  ;;  %v640_v30 = vmul.f32 %v628_v48, %v573_v2  ;;  %vm1537_vm10 = vmor %vm490_vm8, %vm491_vm9  ;;  %v306_v36 = vpop.f32.mrf.mxu0 }
 0x105   : > { %v1529_v3 = vpop.eup %947  ;;  %951 = vrcp.f32 %v1520_v26  ;;  %v494_v32 = vand.u32 2147483647, %v1422_v46  ;;  %v496_v6 = vand.u32 2147483648, %v1422_v46  ;;  %v623_v9 = vsub.f32 %v383_v61, %v1287_v38 }
 0x106   : > { %v501_v4 = vmul.f32 %v1529_v3, %v1483_v17  ;;  %953 = vrcp.f32 %v1525_v1  ;;  %v652_v11 = vadd.f32 %v640_v30, %v1280_v37  ;;  %v493_v12 = vsel %vm1537_vm10, %v1469_v15, %v489_v0 }
 0x107   : > { %vm495_vm11 = vcmp.eq.f32.partialorder %v494_v32, 8.507059e+37  ;;  %v319_v34 = vadd.f32 %v318_v52, %v1323_v55  ;;  %v497_v13 = vor.u32 1.1754944e-38, %v496_v6  ;;  %v578_v18 = vmul.f32 %v1497_v50, %v577_v63 }
 0x108   : > { %v502_v58 = vsub.f32 1.0, %v501_v4  ;;  %vm580_vm12 = vweird.f32 %v1457_v8  ;;  %664 = vst [vmem:[%s1414_s18 + $0x40] sm:$0xff] %v652_v11  ;;  %vm581_vm13 = vweird.f32 %v1497_v50  ;;  %v584_v19 = vand.u32 2147483647, %v1457_v8 }
 0x109   : > { %v389_v46 = vmax.f32 %v319_v34, 0.0  ;;  %v586_v37 = vand.u32 2147483648, %v1457_v8  ;;  %v498_v51 = vsel %vm495_vm11, %v497_v13, %v493_v12  ;;  %v579_v15 = vadd.f32 %v1497_v50, %v578_v18  ;;  %vm582_vm14 = vmor %vm580_vm12, %vm581_vm13 }
 0x10a   : > { %v950_v20 = vpop.eup %949  ;;  %v304_v21 = vadd.f32 %v303_v10, %v1323_v55  ;;  %v503_v22 = vmul.f32 %v1529_v3, %v502_v58  ;;  %v635_v29 = vmul.f32 %v623_v9, %v498_v51  ;;  %vm585_vm15 = vcmp.eq.f32.partialorder %v584_v19, 8.507059e+37 }
 0x10b   : > { %v952_v24 = vpop.eup %951  ;;  %v1557_v25 = vadd.f32 1.0, %v950_v20  ;;  %v587_v28 = vor.u32 1.1754944e-38, %v586_v37  ;;  %v583_v7 = vsel %vm582_vm14, %v1497_v50, %v579_v15  ;;  %v629_v62 = vsub.f32 %v389_v46, %v1290_v39 }
 0x10c   : > { %v1559_v31 = vpop.eup %953  ;;  %v591_v8 = vmul.f32 %v952_v24, %v1520_v26  ;;  %v384_v33 = vmax.f32 %v304_v21, 0.0  ;;  %v647_v16 = vadd.f32 %v635_v29, %v1287_v38  ;;  %v504_v53 = vadd.f32 %v1529_v3, %v503_v22 }
 0x10d   : > { %v516_v47 = vmul.f32 %v1559_v31, %v1525_v1  ;;  %955 = vrcp.f32 %v1557_v25  ;;  %v588_v44 = vsel %vm585_vm15, %v587_v28, %v583_v7  ;;  %vm505_vm0 = vweird.f32 %v1483_v17 }
 0x10e   : > { %v592_v48 = vsub.f32 1.0, %v591_v8  ;;  %v641_v49 = vmul.f32 %v629_v62, %v588_v44  ;;  %659 = vst [vmem:[%s1414_s18 + $0x18] sm:$0xff] %v647_v16  ;;  %vm506_vm1 = vweird.f32 %v1529_v3  ;;  %v509_v50 = vand.u32 2147483647, %v1483_v17 }
 0x10f   : > { %v517_v35 = vsub.f32 1.0, %v516_v47  ;;  %v511_v54 = vand.u32 2147483648, %v1483_v17  ;;  %vm1575_vm2 = vmor %vm505_vm0, %vm506_vm1  ;;  %v624_v56 = vsub.f32 %v384_v33, %v1297_v40  ;;  %v322_v52 = vadd.f32 %v321_v27, %v1323_v55 }
 0x110   : > { %v653_v45 = vadd.f32 %v641_v49, %v1290_v39  ;;  %v593_v14 = vmul.f32 %v952_v24, %v592_v48  ;;  %v508_v23 = vsel %vm1575_vm2, %v1529_v3, %v504_v53  ;;  %vm510_vm3 = vcmp.eq.f32.partialorder %v509_v50, 8.507059e+37 }
 0x111   : > { %v512_v57 = vor.u32 1.1754944e-38, %v511_v54  ;;  %vm595_vm4 = vweird.f32 %v1520_v26  ;;  %v390_v39 = vmax.f32 %v322_v52, 0.0  ;;  %vm596_vm5 = vweird.f32 %v952_v24 }
 0x112   : > { %665 = vst [vmem:[%s1414_s18 + $0x48] sm:$0xff] %v653_v45  ;;  %v594_v17 = vadd.f32 %v952_v24, %v593_v14  ;;  %v599_v59 = vand.u32 2147483647, %v1520_v26  ;;  %vm1587_vm6 = vmor %vm595_vm4, %vm596_vm5  ;;  %v601_v63 = vand.u32 2147483648, %v1520_v26  ;;  %v307_v2 = vadd.f32 %v306_v36, %v1323_v55  ;;  %v324_v26 = vpop.f32.mrf.mxu2 }
 0x113   : > { %v956_v60 = vpop.eup %955  ;;  %v513_v61 = vsel %vm510_vm3, %v512_v57, %v508_v23  ;;  %v518_v3 = vmul.f32 %v1559_v31, %v517_v35  ;;  %v630_v6 = vsub.f32 %v390_v39, %v1300_v41  ;;  %vm520_vm8 = vweird.f32 %v1525_v1 }
 0x114   : > { %v606_v30 = vmul.f32 %v956_v60, %v1557_v25  ;;  %v636_v32 = vmul.f32 %v624_v56, %v513_v61  ;;  %v598_v4 = vsel %vm1587_vm6, %v952_v24, %v594_v17  ;;  %vm600_vm7 = vcmp.eq.f32.partialorder %v599_v59, 8.507059e+37 }
 0x115   : > { %v602_v5 = vor.u32 1.1754944e-38, %v601_v63  ;;  %v385_v9 = vmax.f32 %v307_v2, 0.0  ;;  %v519_v10 = vadd.f32 %v1559_v31, %v518_v3  ;;  %vm521_vm9 = vweird.f32 %v1559_v31 }
 0x116   : > { %v607_v11 = vsub.f32 1.0, %v606_v30  ;;  %v648_v12 = vadd.f32 %v636_v32, %v1297_v40  ;;  %vm1602_vm10 = vmor %vm520_vm8, %vm521_vm9  ;;  %v524_v13 = vand.u32 2147483647, %v1525_v1  ;;  %v526_v18 = vand.u32 2147483648, %v1525_v1 }
 0x117   : > { %v603_v34 = vsel %vm600_vm7, %v602_v5, %v598_v4  ;;  %v625_v46 = vsub.f32 %v385_v9, %v1307_v42  ;;  %v523_v40 = vsel %vm1602_vm10, %v1559_v31, %v519_v10  ;;  %v325_v37 = vadd.f32 %v324_v26, %v1323_v55 }
 0x118   : > { %660 = vst [vmem:[%s1414_s18 + $0x20] sm:$0xff] %v648_v12  ;;  %v642_v19 = vmul.f32 %v630_v6, %v603_v34  ;;  %v608_v20 = vmul.f32 %v956_v60, %v607_v11  ;;  %vm525_vm11 = vcmp.eq.f32.partialorder %v524_v13, 8.507059e+37  ;;  %v527_v51 = vor.u32 1.1754944e-38, %v526_v18 }
 0x119   : > { %vm610_vm12 = vweird.f32 %v1557_v25  ;;  %vm611_vm13 = vweird.f32 %v956_v60  ;;  %v391_v15 = vmax.f32 %v325_v37, 0.0  ;;  %v614_v22 = vand.u32 2147483647, %v1557_v25 }
 0x11a   : > { %v654_v1 = vadd.f32 %v642_v19, %v1300_v41  ;;  %v609_v21 = vadd.f32 %v956_v60, %v608_v20  ;;  %v528_v24 = vsel %vm525_vm11, %v527_v51, %v523_v40  ;;  %vm612_vm14 = vmor %vm610_vm12, %vm611_vm13  ;;  %v616_v29 = vand.u32 2147483648, %v1557_v25 }
 0x11b   : > { %v637_v55 = vmul.f32 %v625_v46, %v528_v24  ;;  %v631_v27 = vsub.f32 %v391_v15, %v1310_v43  ;;  %vm615_vm15 = vcmp.eq.f32.partialorder %v614_v22, 8.507059e+37 }
 0x11c   : > { %666 = vst [vmem:[%s1414_s18 + $0x50] sm:$0xff] %v654_v1  ;;  %v613_v28 = vsel %vm612_vm14, %v956_v60, %v609_v21  ;;  %v617_v41 = vor.u32 1.1754944e-38, %v616_v29 }
 0x11d   : > { %v649_v31 = vadd.f32 %v637_v55, %v1307_v42 }
 0x11e   : > { %v618_v8 = vsel %vm615_vm15, %v617_v41, %v613_v28 }
 0x11f   : > { %661 = vst [vmem:[%s1414_s18 + $0x28] sm:$0xff] %v649_v31  ;;  %v643_v25 = vmul.f32 %v631_v27, %v618_v8 }
 0x121   : > { %v655_v7 = vadd.f32 %v643_v25, %v1310_v43 }
 0x123   : > { %667 = vst [vmem:[%s1414_s18 + $0x58] sm:$0xff] %v655_v7 }
 0x124   : > { %1074 = shalt.err (!%p1071_p10)
}
 0x125   : > { %s1125_s24 = smov 128   ;;  %s1126_s25 = smov 8  }
 0x126   : > { %846 = dma.vmem_to_hbm [thread:$0]  (%p1212_p0), %s682_s28, 1536, %s684_s29, %s669_s4, %s1125_s24, %s1125_s24, %s1126_s25  }
 0x127 PF: > { %p868_p11 = scmp.ge.s32.totalorder %s1117_s15, 2  ;;  %s698_s26 = sand.u32 1, %s1105_s12  }
 0x128   : > { %s699_s30 = scalar_lea.sflag [#allocation4], %s698_s26 }
 0x129   : > { %p860_p12 = pnand %p868_p11, %p1182_p6 }
 0x12b   : > { %p861_p13 = pneg %p860_p12 }
 0x12d   : > { %1100 = dma.done.wait (%p861_p13), %s699_s30, 1536  }
 0x12e   : > { %1102 = vsyncadd (%p861_p13), %s699_s30, 4294965760  ;;  %p17_p3 = scmp.ge.s32.totalorder %s1202_s6, 6   ;;  %s1690_s12 = smov %s1109_s13 }
 0x12f   : > { %s1691_s13 = smov %s1113_s14  ;;  %s1692_s14 = smov %s1218_s10 }
 0x130   : > { %s1693_s15 = smov %s1202_s6  ;;  %19 = sbr.rel (!%p17_p3) target bundleno = 6 (0x6), region = 85 }
 0x135   :  { %705 = vsyncpa [#allocation3], 1 }
 0x136   :  { %707 = vsyncpa [#allocation3 + $0x1], 1 }
 0x137   :  { %708 = vsyncpa [#allocation6], 1 }
 0x138   :  { %709 = vsyncpa [#allocation4], 1 }
 0x139   :  { %711 = vsyncpa [#allocation4 + $0x1], 1 }

</bundles_post_ra>
